<compile_context>
chip_gen: v6e
topology: v6e:2x2x1
jax: 0.10.0
libtpu: 0.0.40
codegen_flags: <defaults>
</compile_context>

<pallas_src>
import jax
import jax.numpy as jnp
from jax.experimental import pallas as pl
from jax.experimental.pallas import tpu as pltpu


def _round_up(x, m):
    return ((x + m - 1) // m) * m


def dice_loss(output, target, smooth=1e-6, block_bytes=1 << 20):
    """output: (N, C, *spatial) float; target: (N, 1, *spatial) integer labels."""
    N, C = output.shape[0], output.shape[1]
    S = 1
    for d in output.shape[2:]:
        S *= d

    # Free (contiguous) reshapes -- no transpose, no extra HBM round trip.
    x = output.reshape(N, C, S)                       # native dtype streamed as-is
    labels = target.reshape(N, 1, S).astype(jnp.int32)

    # Lane-dense spatial tile sized so one activation block is ~block_bytes.
    itemsize = jnp.dtype(x.dtype).itemsize
    block_s = max(128, (block_bytes // (C * itemsize)) // 128 * 128)
    block_s = min(block_s, _round_up(S, 128))
    grid_s = pl.cdiv(S, block_s)

    def kernel(x_ref, t_ref, out_ref, acc_i, acc_d):
        s_id = pl.program_id(1)

        @pl.when(s_id == 0)
        def _init():
            acc_i[...] = jnp.zeros_like(acc_i)
            acc_d[...] = jnp.zeros_like(acc_d)

        xf = x_ref[...].astype(jnp.float32)                       # (C, block_s)
        lbl = t_ref[...]                                          # (1, block_s) int32

        lane = jax.lax.broadcasted_iota(jnp.int32, (1, block_s), 1)
        valid = (s_id * block_s + lane) < S                       # mask tail block
        ch = jax.lax.broadcasted_iota(jnp.int32, (C, block_s), 0)
        onehot = (ch == lbl) & valid                              # bool (C, block_s)
        # TODO(synk): out-of-range labels silently contribute zero; PyTorch F.one_hot raises.

        x_valid = jnp.where(valid, xf, 0.0)
        acc_i[...] += jnp.where(onehot, xf, 0.0)                  # sum(output * onehot)
        acc_d[...] += x_valid + onehot.astype(jnp.float32)        # sum(output) + sum(onehot)

        @pl.when(s_id == pl.num_programs(1) - 1)
        def _finalize():
            inter = jnp.sum(acc_i[...])
            denom = jnp.sum(acc_d[...])
            col = jax.lax.broadcasted_iota(jnp.int32, (8, 128), 1)
            out_ref[...] = jnp.where(col == 0, inter,
                                     jnp.where(col == 1, denom, 0.0))

    partials = pl.pallas_call(
        kernel,
        out_shape=jax.ShapeDtypeStruct((N, 8, 128), jnp.float32),
        grid_spec=pltpu.PrefetchScalarGridSpec(
            num_scalar_prefetch=0,
            grid=(N, grid_s),
            in_specs=[
                pl.BlockSpec((None, C, block_s), lambda n, s: (n, 0, s)),
                pl.BlockSpec((None, 1, block_s), lambda n, s: (n, 0, s)),
            ],
            out_specs=pl.BlockSpec((None, 8, 128), lambda n, s: (n, 0, 0)),
            scratch_shapes=[
                pltpu.VMEM((C, block_s), jnp.float32),
                pltpu.VMEM((C, block_s), jnp.float32),
            ],
        ),
        compiler_params=pltpu.CompilerParams(
            dimension_semantics=("parallel", "arbitrary")),
    )(x, labels)

    intersect = jnp.sum(partials[:, 0, 0])
    denom = jnp.sum(partials[:, 0, 1])
    dice = (2.0 * intersect + smooth) / (denom + smooth)
    return 1.0 - dice


if __name__ == "__main__":
    key = jax.random.PRNGKey(0)
    k1, k2 = jax.random.split(key)

    N, C, H, W = 2, 4, 16, 16
    # Probabilities-like output and integer label map, as the module expects.
    output = jax.nn.softmax(jax.random.normal(k1, (N, C, H, W), jnp.float32), axis=1)
    target = jax.random.randint(k2, (N, 1, H, W), 0, C, jnp.int32)

    loss = jax.block_until_ready(dice_loss(output, target))

    # Plain-JAX reference mirroring the PyTorch semantics (sanity check).
    onehot = jax.nn.one_hot(target[:, 0], C, dtype=jnp.float32)   # (N, H, W, C)
    onehot = jnp.moveaxis(onehot, -1, 1)                          # (N, C, H, W)
    inter = jnp.sum(output * onehot)
    ref = 1.0 - (2.0 * inter + 1e-6) / (jnp.sum(output) + jnp.sum(onehot) + 1e-6)
    assert abs(float(loss) - float(ref)) < 1e-4, (float(loss), float(ref))

    print("KERNEL_OK")
</pallas_src>

<mosaic_0001>
module attributes {stable_mosaic.version = 11 : i64} {
  func.func @kernel(%arg0: i32, %arg1: i32, %arg2: memref<1x4x256xf32, #tpu.memory_space<vmem>>, %arg3: memref<1x1x256xi32, #tpu.memory_space<vmem>>, %arg4: memref<1x8x128xf32, #tpu.memory_space<vmem>>, %arg5: memref<4x256xf32, #tpu.memory_space<vmem>>, %arg6: memref<4x256xf32, #tpu.memory_space<vmem>>) attributes {dimension_semantics = [#tpu.dimension_semantics<parallel>, #tpu.dimension_semantics<arbitrary>], iteration_bounds = array<i64: 2, 1>, scalar_prefetch = 0 : i64, scratch_operands = 2 : i64, tpu.core_type = #tpu.core_type<tc>, window_params = [{transform_indices = @transform_0, window_bounds = array<i64: 1, 4, 256>}, {transform_indices = @transform_1, window_bounds = array<i64: 1, 1, 256>}, {transform_indices = @transform_2, window_bounds = array<i64: 1, 8, 128>}]} {
    %c0_i32 = arith.constant 0 : i32
    %0 = arith.cmpi eq, %arg1, %c0_i32 : i32
    %1 = arith.extui %0 : i1 to i32
    %c0_i32_0 = arith.constant 0 : i32
    %2 = arith.cmpi ne, %1, %c0_i32_0 : i32
    scf.if %2 {
      %cst_18 = arith.constant 0.000000e+00 : f32
      %36 = vector.broadcast %cst_18 : f32 to vector<4x256xf32>
      %c0_19 = arith.constant 0 : index
      %c0_20 = arith.constant 0 : index
      %37 = vector.load %arg5[%c0_19, %c0_20] : memref<4x256xf32, #tpu.memory_space<vmem>>, vector<4x256xf32>
      tpu.vector_store %arg5[%c0_19, %c0_20], %36 {strides = array<i32>} : memref<4x256xf32, #tpu.memory_space<vmem>>, vector<4x256xf32>,
      %cst_21 = arith.constant 0.000000e+00 : f32
      %38 = vector.broadcast %cst_21 : f32 to vector<4x256xf32>
      %c0_22 = arith.constant 0 : index
      %c0_23 = arith.constant 0 : index
      %39 = vector.load %arg6[%c0_22, %c0_23] : memref<4x256xf32, #tpu.memory_space<vmem>>, vector<4x256xf32>
      tpu.vector_store %arg6[%c0_22, %c0_23], %38 {strides = array<i32>} : memref<4x256xf32, #tpu.memory_space<vmem>>, vector<4x256xf32>,
    } else {
    }
    %c0 = arith.constant 0 : index
    %c0_1 = arith.constant 0 : index
    %c0_2 = arith.constant 0 : index
    %3 = vector.load %arg2[%c0, %c0_1, %c0_2] : memref<1x4x256xf32, #tpu.memory_space<vmem>>, vector<1x4x256xf32>
    %4 = vector.shape_cast %3 : vector<1x4x256xf32> to vector<4x256xf32>
    %c0_3 = arith.constant 0 : index
    %c0_4 = arith.constant 0 : index
    %c0_5 = arith.constant 0 : index
    %5 = vector.load %arg3[%c0_3, %c0_4, %c0_5] : memref<1x1x256xi32, #tpu.memory_space<vmem>>, vector<1x1x256xi32>
    %6 = vector.shape_cast %5 : vector<1x1x256xi32> to vector<1x256xi32>
    %7 = tpu.iota {dimensions = array<i32: 1>} : vector<1x256xi32>
    %c256_i32 = arith.constant 256 : i32
    %8 = arith.muli %arg1, %c256_i32 : i32
    %9 = vector.broadcast %8 : i32 to vector<1x256xi32>
    %10 = arith.addi %9, %7 : vector<1x256xi32>
    %c256_i32_6 = arith.constant 256 : i32
    %11 = vector.broadcast %c256_i32_6 : i32 to vector<1x256xi32>
    %12 = arith.cmpi slt, %10, %11 : vector<1x256xi32>
    %13 = tpu.iota {dimensions = array<i32: 0>} : vector<4x256xi32>
    %14 = vector.broadcast %6 : vector<1x256xi32> to vector<4x256xi32>
    %15 = arith.cmpi eq, %13, %14 : vector<4x256xi32>
    %16 = vector.broadcast %12 : vector<1x256xi1> to vector<4x256xi1>
    %17 = arith.andi %15, %16 : vector<4x256xi1>
    %cst = arith.constant 0.000000e+00 : f32
    %18 = vector.shape_cast %12 : vector<1x256xi1> to vector<1x256xi1>
    %19 = vector.broadcast %18 : vector<1x256xi1> to vector<4x256xi1>
    %20 = vector.broadcast %cst : f32 to vector<4x256xf32>
    %21 = arith.select %19, %4, %20 : vector<4x256xi1>, vector<4x256xf32>
    %c0_7 = arith.constant 0 : index
    %c0_8 = arith.constant 0 : index
    %22 = vector.load %arg5[%c0_7, %c0_8] : memref<4x256xf32, #tpu.memory_space<vmem>>, vector<4x256xf32>
    %cst_9 = arith.constant 0.000000e+00 : f32
    %23 = vector.broadcast %cst_9 : f32 to vector<4x256xf32>
    %24 = arith.select %17, %4, %23 : vector<4x256xi1>, vector<4x256xf32>
    %25 = arith.addf %22, %24 : vector<4x256xf32>
    %c0_10 = arith.constant 0 : index
    %c0_11 = arith.constant 0 : index
    %26 = vector.load %arg5[%c0_10, %c0_11] : memref<4x256xf32, #tpu.memory_space<vmem>>, vector<4x256xf32>
    tpu.vector_store %arg5[%c0_10, %c0_11], %25 {strides = array<i32>} : memref<4x256xf32, #tpu.memory_space<vmem>>, vector<4x256xf32>,
    %c0_12 = arith.constant 0 : index
    %c0_13 = arith.constant 0 : index
    %27 = vector.load %arg6[%c0_12, %c0_13] : memref<4x256xf32, #tpu.memory_space<vmem>>, vector<4x256xf32>
    %28 = arith.extui %17 : vector<4x256xi1> to vector<4x256xi32>
    %29 = arith.sitofp %28 : vector<4x256xi32> to vector<4x256xf32>
    %30 = arith.addf %21, %29 : vector<4x256xf32>
    %31 = arith.addf %27, %30 : vector<4x256xf32>
    %c0_14 = arith.constant 0 : index
    %c0_15 = arith.constant 0 : index
    %32 = vector.load %arg6[%c0_14, %c0_15] : memref<4x256xf32, #tpu.memory_space<vmem>>, vector<4x256xf32>
    tpu.vector_store %arg6[%c0_14, %c0_15], %31 {strides = array<i32>} : memref<4x256xf32, #tpu.memory_space<vmem>>, vector<4x256xf32>,
    %c0_i32_16 = arith.constant 0 : i32
    %33 = arith.cmpi eq, %arg1, %c0_i32_16 : i32
    %34 = arith.extui %33 : i1 to i32
    %c0_i32_17 = arith.constant 0 : i32
    %35 = arith.cmpi ne, %34, %c0_i32_17 : i32
    scf.if %35 {
      %c0_18 = arith.constant 0 : index
      %c0_19 = arith.constant 0 : index
      %36 = vector.load %arg5[%c0_18, %c0_19] : memref<4x256xf32, #tpu.memory_space<vmem>>, vector<4x256xf32>
      %37 = vector.shape_cast %36 : vector<4x256xf32> to vector<1x4x256xf32>
      %cst_20 = arith.constant dense<0.000000e+00> : vector<1xf32>
      %38 = vector.multi_reduction <add>, %37, %cst_20 [1, 2] : vector<1x4x256xf32> to vector<1xf32>
      %39 = vector.shape_cast %38 : vector<1xf32> to vector<1x1x1xf32>
      %40 = vector.extract %39[0, 0, 0] : f32 from vector<1x1x1xf32>
      %c0_21 = arith.constant 0 : index
      %c0_22 = arith.constant 0 : index
      %41 = vector.load %arg6[%c0_21, %c0_22] : memref<4x256xf32, #tpu.memory_space<vmem>>, vector<4x256xf32>
      %42 = vector.shape_cast %41 : vector<4x256xf32> to vector<1x4x256xf32>
      %cst_23 = arith.constant dense<0.000000e+00> : vector<1xf32>
      %43 = vector.multi_reduction <add>, %42, %cst_23 [1, 2] : vector<1x4x256xf32> to vector<1xf32>
      %44 = vector.shape_cast %43 : vector<1xf32> to vector<1x1x1xf32>
      %45 = vector.extract %44[0, 0, 0] : f32 from vector<1x1x1xf32>
      %46 = tpu.iota {dimensions = array<i32: 1>} : vector<8x128xi32>
      %c0_i32_24 = arith.constant 0 : i32
      %47 = vector.broadcast %c0_i32_24 : i32 to vector<8x128xi32>
      %48 = arith.cmpi eq, %46, %47 : vector<8x128xi32>
      %c1_i32 = arith.constant 1 : i32
      %49 = vector.broadcast %c1_i32 : i32 to vector<8x128xi32>
      %50 = arith.cmpi eq, %46, %49 : vector<8x128xi32>
      %cst_25 = arith.constant 0.000000e+00 : f32
      %51 = vector.broadcast %45 : f32 to vector<8x128xf32>
      %52 = vector.broadcast %cst_25 : f32 to vector<8x128xf32>
      %53 = arith.select %50, %51, %52 : vector<8x128xi1>, vector<8x128xf32>
      %54 = vector.broadcast %40 : f32 to vector<8x128xf32>
      %55 = arith.select %48, %54, %53 : vector<8x128xi1>, vector<8x128xf32>
      %c0_26 = arith.constant 0 : index
      %c0_27 = arith.constant 0 : index
      %c0_28 = arith.constant 0 : index
      %56 = vector.load %arg4[%c0_26, %c0_27, %c0_28] : memref<1x8x128xf32, #tpu.memory_space<vmem>>, vector<1x8x128xf32>
      %57 = vector.shape_cast %56 : vector<1x8x128xf32> to vector<8x128xf32>
      %58 = vector.shape_cast %55 : vector<8x128xf32> to vector<1x8x128xf32>
      tpu.vector_store %arg4[%c0_26, %c0_27, %c0_28], %58 {strides = array<i32>} : memref<1x8x128xf32, #tpu.memory_space<vmem>>, vector<1x8x128xf32>,
    } else {
    }
    return
  }
  func.func @transform_0(%arg0: i32, %arg1: i32) -> (i32, i32, i32) {
    %c0_i32 = arith.constant 0 : i32
    %c0_i32_0 = arith.constant 0 : i32
    return %arg0, %c0_i32, %arg1 : i32, i32, i32
  }
  func.func @transform_1(%arg0: i32, %arg1: i32) -> (i32, i32, i32) {
    %c0_i32 = arith.constant 0 : i32
    %c0_i32_0 = arith.constant 0 : i32
    return %arg0, %c0_i32, %arg1 : i32, i32, i32
  }
  func.func @transform_2(%arg0: i32, %arg1: i32) -> (i32, i32, i32) {
    %c0_i32 = arith.constant 0 : i32
    %c0_i32_0 = arith.constant 0 : i32
    %c0_i32_1 = arith.constant 0 : i32
    return %arg0, %c0_i32, %c0_i32_0 : i32, i32, i32
  }
}

</mosaic_0001>

<bundles_post_ra>
// kernel: tpu_custom_call.1
= control target key start
LH: loop header
LB: loop body
LE: loop exit
PB: predicated region body
PF: predicated region fallthrough
CT: control target
= control target key end

     0   :  { %7 = vsyncpa [#allocation5], 0  ;;  %s882_s0 = inlined_call_operand.hbm [shape: f32[2,4,256], index: 0, kind: input, shape index: {}]   ;;  %s883_s1 = inlined_call_operand.hbm [shape: s32[2,1,256], index: 1, kind: input, shape index: {}]   ;;  %s884_s2 = inlined_call_operand.hbm [shape: f32[2,8,128], index: 2, kind: output, shape index: {}]  }
   0x1   :  { %9 = vsyncpa [#allocation5 + $0x1], 0 }
   0x2   :  { %10 = vsyncpa [#allocation8], 0 }
   0x3   :  { %12 = vsyncpa [#allocation8 + $0x1], 0 }
   0x4   :  { %13 = vsyncpa [#allocation6], 0 }
   0x5   :  { %15 = vsyncpa [#allocation6 + $0x1], 0  ;;  %s704_s9 = smov 0   ;;  %s706_s10 = smov 0  }
   0x6   :  { %s708_s11 = smov 0   ;;  %s710_s12 = smov 0  }
   0x7   :  { %s712_s13 = smov 0   ;;  %s714_s14 = smov 0  }
   0x8 LB: > { %s446_s15 = sadd.s32 4294967295, %s683_s14   ;;  %s447_s16 = sadd.s32 4294967294, %s683_s14   ;;  %s683_s14 = sphi %s714_s14, %s21_s14   ;;  %s679_s13 = sphi %s712_s13, %s896_s13   ;;  %s675_s12 = sphi %s710_s12, %s895_s12   ;;  %s671_s11 = sphi %s708_s11, %s894_s11   ;;  %s667_s10 = sphi %s706_s10, %s893_s10   ;;  %s663_s9 = sphi %s704_s9, %s892_s9  }
   0x9   : > { %s33_s17 = sadd.s32 1, %s679_s13  ;;  %s42_s18 = sadd.s32 1, %s671_s11 }
   0xa   : > { %p35_p0 = scmp.ge.s32.totalorder %s33_s17, 2  ;;  %p49_p1 = scmp.ne.s32.totalorder %s671_s11, %s667_s10 }
   0xb   : > { %p50_p2 = scmp.eq.s32.totalorder %s683_s14, 0  ;;  %p55_p3 = scmp.ne.s32.totalorder %s667_s10, %s663_s9 }
   0xc   : > { %s898_s17 = smov (%p35_p0, %s33_s17), 0  ;;  %p56_p5 = scmp.eq.s32.totalorder %s446_s15, 0 }
   0xd   : > { %p745_p4 = por %p50_p2, %p49_p1  ;;  %s37_s20 = ssub.s32 %s679_s13, %s898_s17 }
   0xe   : > { %p107_p6 = scmp.eq.s32.totalorder %s446_s15, 1  ;;  %p40_p7 = scmp.eq.s32.totalorder %s37_s20, 0 }
   0xf   : > { %p751_p8 = por %p56_p5, %p55_p3  ;;  %p113_p10 = scmp.eq.s32.totalorder %s447_s16, 1 }
  0x10   : > { %p755_p9 = por %p107_p6, %p49_p1  ;;  %p491_p13 = scmp.lt.s32.totalorder %s683_s14, 2 }
  0x11   : > { %s760_s23 = scalar_select %p40_p7, %s671_s11, %s42_s18  }
  0x12   : > { %p762_p11 = por %p113_p10, %p55_p3  ;;  %s769_s25 = sand.u32 1, %s671_s11  }
  0x13   : > { %s450_s26 = sshll.u32 %s769_s25, 3  ;;  %s466_s27 = sshll.u32 %s679_s13, 7 }
  0x14   : > { %s145_s30 = scalar_lea.hbm %s882_s0, %s466_s27  ;;  %s137_s3 = scalar_lea.vmem [#allocation4], %s450_s26 }
  0x15   : > { %s147_s4 = sshll.u32 %s137_s3, 4  ;;  %p778_p0 = pnand %p491_p13, %p745_p4  ;;  %s148_s4 = int_to_ptr.vmem [resolvable:$true] %s147_s4 }
  0x16   : > { %p456_p1 = scmp.ge.s32.totalorder %s683_s14, 1  ;;  %p173_p2 = scmp.lt.s32.totalorder %s683_s14, 3 }
  0x17   : > { %s134_s6 = scalar_lea.sflag [#allocation5], %s769_s25  ;;  %p545_p3 = pneg %p778_p0 }
  0x18   : > { %s556_s7 = scalar_lea.vmem %s148_s4, 128  ;;  %s685_s8 = smov [#allocation4]  }
  0x19   : > { %p557_p5 = scmp.ne.s32.totalorder %s148_s4, %s556_s7  ;;  %s561_s15 = sshll.u32 %s685_s8, 4  ;;  %s562_s15 = int_to_ptr.vmem [resolvable:$false] %s561_s15 }
  0x1a   : > { %s563_s16 = scalar_lea.vmem %s562_s15, 256  ;;  %p564_p4 = scmp.lt.s32.totalorder %s148_s4, %s562_s15 }
  0x1b   : > { %p559_p6 = pnand %p557_p5, %p545_p3  ;;  %p565_p10 = scmp.lt.s32.totalorder %s563_s16, %s556_s7 }
  0x1d   : > { %p560_p7 = pneg %p559_p6  ;;  %p566_p13 = por %p565_p10, %p564_p4 }
  0x1f   : > { %p567_p12 = pnand %p566_p13, %p560_p7 }
  0x21   : > { %570 = shalt.err (!%p567_p12)
}
  0x22   : > { %483 = dma.hbm_to_vmem [thread:$0]  (!%p778_p0), %s145_s30, 128, %s148_s4, %s134_s6  }
  0x23   : > { %p796_p5 = pnand %p456_p1, %p173_p2  ;;  %s453_s19 = sshll.u32 %s769_s25, 1 }
  0x24   : > { %s467_s20 = sshll.u32 %s679_s13, 5  ;;  %s158_s29 = scalar_lea.vmem [#allocation7], %s453_s19 }
  0x25   : > { %s166_s28 = scalar_lea.hbm %s883_s1, %s467_s20  ;;  %s168_s3 = sshll.u32 %s158_s29, 4  ;;  %s169_s3 = int_to_ptr.vmem [resolvable:$true] %s168_s3 }
  0x26   : > { %s155_s7 = scalar_lea.sflag [#allocation8], %s769_s25  ;;  %s584_s8 = scalar_lea.vmem %s169_s3, 32 }
  0x27   : > { %p585_p12 = scmp.ne.s32.totalorder %s169_s3, %s584_s8  ;;  %s686_s30 = smov [#allocation7]  }
  0x28   : > { %s589_s4 = sshll.u32 %s686_s30, 4  ;;  %s590_s4 = int_to_ptr.vmem [resolvable:$false] %s589_s4 }
  0x29   : > { %p587_p6 = pnand %p585_p12, %p545_p3  ;;  %s591_s6 = scalar_lea.vmem %s590_s4, 64 }
  0x2a   : > { %p592_p1 = scmp.lt.s32.totalorder %s169_s3, %s590_s4  ;;  %p593_p2 = scmp.lt.s32.totalorder %s591_s6, %s584_s8 }
  0x2b   : > { %p588_p7 = pneg %p587_p6 }
  0x2c   : > { %p594_p4 = por %p593_p2, %p592_p1 }
  0x2e   : > { %p595_p10 = pnand %p594_p4, %p588_p7 }
  0x30   : > { %598 = shalt.err (!%p595_p10)
}
  0x31   : > { %486 = dma.hbm_to_vmem [thread:$0]  (!%p778_p0), %s166_s28, 32, %s169_s3, %s155_s7  }
  0x32   : > { %177 = sbr.rel (%p796_p5) target bundleno = 294 (0x126), region = 28  ;;  %s814_s25 = sand.u32 (!%p796_p5), 1, %s667_s10  }
  0x33   : > { %s457_s15 = sshll.u32 (!%p796_p5), %s814_s25, 3  ;;  %s180_s16 = scalar_lea.sflag (!%p796_p5), [#allocation5], %s814_s25 }
  0x34   : > { %s183_s19 = scalar_lea.vmem (!%p796_p5), [#allocation4], %s457_s15 }
  0x37   : > { %650 = dma.done.wait (%p751_p8), %s180_s16, 128  }
  0x38   : > { %652 = vsyncadd (%p751_p8), %s180_s16, 4294967168  ;;  %s458_s5 = sshll.u32 %s814_s25, 1  ;;  %s189_s18 = scalar_lea.sflag [#allocation8], %s814_s25 }
  0x39   : > { %s192_s20 = scalar_lea.vmem [#allocation7], %s458_s5 }
  0x3a   : > { %654 = dma.done.wait (%p751_p8), %s189_s18, 32  }
  0x3b   : > { %656 = vsyncadd (%p751_p8), %s189_s18, 4294967264  ;;  %v228_v0 = vlaneseq  ;;  %v226_v4 = vld [vmem:[%s183_s19] sm:$0xff]  ;;  %v227_v5 = vld [vmem:[%s192_s20] sm:$0x3]  ;;  %vm289_vm2 = vcmask 1043456   ;;  %v687_v11 = vmov 0.0  }
  0x3c   : > { %v256_v8 = vcombine.high %v226_v4, %v226_v4  ;;  %s463_s21 = sshll.u32 %s675_s12, 7  ;;  %s217_s27 = scalar_lea.vmem [#allocation9], %s457_s15 }
  0x3d   : > { %v238_v1 = vshrl.u32 %v228_v0, 7  ;;  %v229_v40 = vand.u32 127, %v228_v0  ;;  %s339_s28 = sshll.u32 %s217_s27, 4  ;;  %s840_s8 = scalar_lea.hbm %s884_s2, %s463_s21  ;;  %s340_s28 = int_to_ptr.vmem [resolvable:$true] %s339_s28 }
  0x3e   : > { %s326_s12 = scalar_lea.sflag [#allocation6], %s814_s25  ;;  %s599_s30 = scalar_lea.vmem %s340_s28, 128 }
  0x3f   : > { %v241_v2 = vsub.s32 0, %v238_v1  ;;  %v245_v3 = vsub.s32 1, %v238_v1  ;;  %vm319_vm3 = vcmp.eq.s32.totalorder %v229_v40, 1  ;;  %vm318_vm4 = vcmp.eq.s32.totalorder %v229_v40, 0  ;;  %p600_p8 = scmp.ne.s32.totalorder %s340_s28, %s599_s30  ;;  %s688_s4 = smov [#allocation9]  }
  0x40   : > { %s603_s6 = sshll.u32 %s688_s4, 4  ;;  %s604_s6 = int_to_ptr.vmem [resolvable:$false] %s603_s6 }
  0x41   : > { %v242_v6 = vrot.slane %v227_v5, %v241_v2  ;;  %v246_v7 = vrot.slane %v227_v5, %v245_v3  ;;  %p601_p0 = pnand %p600_p8, %p755_p9  ;;  %s605_s15 = scalar_lea.vmem %s604_s6, 256 }
  0x42   : > { %p606_p13 = scmp.lt.s32.totalorder %s340_s28, %s604_s6  ;;  %p607_p5 = scmp.lt.s32.totalorder %s605_s15, %s599_s30 }
  0x43   : > { %vm247_vm0 = vcmp.eq.s32.totalorder %v238_v1, %v242_v6  ;;  %vm248_vm1 = vcmp.eq.s32.totalorder %v238_v1, %v246_v7  ;;  %p602_p3 = pneg %p601_p0 }
  0x44   : > { %v261_v9 = vsel %vm247_vm0, %v226_v4, 0.0  ;;  %v262_v10 = vsel %vm248_vm1, %v256_v8, 0.0  ;;  %v460_v12 = vsel %vm247_vm0, 1.0, %v687_v11  ;;  %v461_v13 = vsel %vm248_vm1, 1.0, %v687_v11  ;;  %p608_p12 = por %p607_p5, %p606_p13 }
  0x45   : > { %v265_v14 = vcombine.low %v261_v9, %v262_v10  ;;  %v468_v15 = vcombine.low %v262_v10, %v262_v10  ;;  %v274_v16 = vadd.f32 %v460_v12, %v226_v4  ;;  %v275_v17 = vadd.f32 %v461_v13, %v256_v8 }
  0x46   : > { %p609_p6 = pnand %p608_p12, %p602_p3 }
  0x47   : > { %v290_v18 = vsel %vm289_vm2, %v265_v14, 0.0  ;;  %v291_v19 = vsel %vm289_vm2, %v468_v15, 0.0  ;;  %v278_v20 = vcombine.low %v274_v16, %v275_v17  ;;  %v469_v21 = vcombine.low %v275_v17, %v275_v17 }
  0x48   : > { %v292_v22 = vadd.f32 %v291_v19, %v290_v18 }
  0x49   : > { %v306_v23 = vsel %vm289_vm2, %v278_v20, 0.0  ;;  %v307_v24 = vsel %vm289_vm2, %v469_v21, 0.0 }
  0x4a   : > { %293 = vadd.xlane.f32.xlu0 %v292_v22  ;;  %v308_v25 = vadd.f32 %v307_v24, %v306_v23 }
  0x4e   : > { %309 = vadd.xlane.f32.xlu0 %v308_v25 }
  0xd3   : > { %v294_v26 = vpop.xlane.xlu0 %293 }
  0xd4   : > { %v295_v27 = vrot.slane %v294_v26, 4 }
  0xd6   : > { %v296_v28 = vadd.f32 %v295_v27, %v294_v26 }
  0xd7   : > { %v310_v29 = vpop.xlane.xlu0 %309 }
  0xd8   : > { %v297_v30 = vrot.slane %v296_v28, 2  ;;  %v311_v31 = vrot.slane %v310_v29, 4 }
  0xda   : > { %v312_v32 = vadd.f32 %v311_v31, %v310_v29  ;;  %v298_v33 = vadd.f32 %v297_v30, %v296_v28 }
  0xdc   : > { %v313_v34 = vrot.slane %v312_v32, 2  ;;  %v299_v35 = vrot.slane %v298_v33, 1 }
  0xde   : > { %v314_v36 = vadd.f32 %v313_v34, %v312_v32  ;;  %v300_v37 = vadd.f32 %v299_v35, %v298_v33 }
  0xe0   : > { %470 = vpush %v300_v37  ;;  %v315_v38 = vrot.slane %v314_v36, 1 }
  0xe2   : > { %v316_v39 = vadd.f32 %v315_v38, %v314_v36 }
  0xe4   : > { %472 = vpush %v316_v39 }
 0x111   : > { %s471_s26 = spop %470 }
 0x112   : > { %v322_v42 = vstv %s471_s26 }
 0x115   : > { %s473_s29 = spop %472 }
 0x116   : > { %v320_v41 = vstv %s473_s29 }
 0x117   : > { %v321_v43 = vsel %vm319_vm3, %v320_v41, 0.0 }
 0x118   : > { %v323_v44 = vsel %vm318_vm4, %v322_v42, %v321_v43 }
 0x119   : > { %324 = vst [vmem:[%s217_s27] sm:$0xff] %v323_v44 }
 0x11a   : > { %612 = shalt.err (!%p609_p6)
}
 0x11b   : > { %s613_s16 = scalar_lea.hbm %s840_s8, 128  ;;  %s617_s5 = scalar_lea.hbm %s884_s2, 256 }
 0x11c   : > { %p614_p7 = scmp.ne.s32.totalorder %s840_s8, %s613_s16  ;;  %p618_p4 = scmp.lt.s32.totalorder %s840_s8, %s884_s2 }
 0x11d   : > { %p619_p10 = scmp.lt.s32.totalorder %s617_s5, %s613_s16 }
 0x11e   : > { %p615_p1 = pnand %p614_p7, %p755_p9 }
 0x11f   : > { %p620_p8 = por %p619_p10, %p618_p4 }
 0x120   : > { %p616_p2 = pneg %p615_p1 }
 0x122   : > { %p621_p0 = pnand %p620_p8, %p616_p2 }
 0x124   : > { %624 = shalt.err (!%p621_p0)
}
 0x125   : > { %478 = dma.vmem_to_hbm [thread:$0]  (%p755_p9), %s340_s28, 128, %s840_s8, %s326_s12  }
 0x126 PF: > { %s351_s21 = sand.u32 1, %s663_s9   ;;  %p891_p3 = scmp.ge.s32.totalorder %s683_s14, 2 }
 0x127   : > { %s352_s26 = scalar_lea.sflag [#allocation6], %s351_s21 }
 0x128   : > { %p488_p13 = pnand %p891_p3, %p762_p11 }
 0x12a   : > { %p489_p5 = pneg %p488_p13 }
 0x12c   : > { %658 = dma.done.wait (%p489_p5), %s352_s26, 128  }
 0x12d   : > { %660 = vsyncadd (%p489_p5), %s352_s26, 4294967168  ;;  %s21_s14 = sadd.s32 1, %s683_s14   ;;  %s892_s9 = smov %s667_s10 }
 0x12e   : > { %p18_p12 = scmp.ge.s32.totalorder %s21_s14, 4   ;;  %s893_s10 = smov %s671_s11 }
 0x12f   : > { %s894_s11 = smov %s760_s23  ;;  %s895_s12 = smov %s679_s13 }
 0x130   : > { %s896_s13 = smov %s898_s17  ;;  %20 = sbr.rel (!%p18_p12) target bundleno = 8 (0x8), region = 94 }
 0x135   :  { %357 = vsyncpa [#allocation5], 1 }
 0x136   :  { %359 = vsyncpa [#allocation5 + $0x1], 1 }
 0x137   :  { %360 = vsyncpa [#allocation8], 1 }
 0x138   :  { %362 = vsyncpa [#allocation8 + $0x1], 1 }
 0x139   :  { %363 = vsyncpa [#allocation6], 1 }
 0x13a   :  { %365 = vsyncpa [#allocation6 + $0x1], 1 }

</bundles_post_ra>
